<compile_context>
chip_gen: v5e
topology: v5e:2x2
jax: 0.10.0
libtpu: 0.0.40
codegen_flags: <defaults>
</compile_context>

<pallas_src>
import functools
import math

import jax
import jax.numpy as jnp
from jax import lax
from jax.experimental import pallas as pl
from jax.experimental.pallas import tpu as pltpu


# ----------------------------------------------------------------------------
# Kernel: depthwise 3x3 conv (pad=1, stride 1) + bias (+ residual) on one
# (H, W, TC) channels-last tile.
# ----------------------------------------------------------------------------
def _dwconv3x3_kernel(x_ref, w_ref, b_ref, o_ref, pad_ref, *, residual):
    _, H, W, TC = o_ref.shape
    dt = pad_ref.dtype

    # Build the zero halo in VMEM.  Borders are re-zeroed every step so
    # correctness does not depend on grid iteration order / megacore sharding.
    pad_ref[0:1, :, :] = jnp.zeros((1, W + 2, TC), dt)
    pad_ref[H + 1:H + 2, :, :] = jnp.zeros((1, W + 2, TC), dt)
    pad_ref[:, 0:1, :] = jnp.zeros((H + 2, 1, TC), dt)
    pad_ref[:, W + 1:W + 2, :] = jnp.zeros((H + 2, 1, TC), dt)

    x = x_ref[0]                                       # (H, W, TC)
    pad_ref[1:H + 1, 1:W + 1, :] = x                   # interior

    w = w_ref[...].astype(jnp.float32)                 # (9, TC), tap-major
    acc = jnp.zeros((H, W, TC), jnp.float32)
    for kh in range(3):                                # static 3x3 taps, unrolled
        for kw in range(3):
            tap = pad_ref[kh:kh + H, kw:kw + W, :].astype(jnp.float32)
            idx = kh * 3 + kw
            acc = acc + tap * w[idx:idx + 1, :]        # (1, TC) broadcast per channel

    acc = acc + b_ref[...].astype(jnp.float32)         # bias (1, TC)
    if residual:                                       # s == 1 path of PosCNN
        acc = acc + x.astype(jnp.float32)
    o_ref[0] = acc.astype(o_ref.dtype)


def _pick_channel_tile(C, H, W, itemsize):
    """Largest channel tile dividing C that keeps blocks + halo scratch well
    under the most restrictive (v5e, 16 MiB) default scoped-VMEM limit."""
    budget = 12 * 1024 * 1024
    for tc in (1024, 768, 512, 384, 256, 128):
        if C % tc == 0:
            vmem = (4 * H * W + (H + 2) * (W + 2)) * tc * itemsize
            if vmem <= budget:
                return tc
    return C  # small / awkward C: take it whole


# ----------------------------------------------------------------------------
# PosCNN forward wrapper
# ----------------------------------------------------------------------------
def pos_cnn_forward(x, weight, bias, *, s=1):
    """x: (B, N, C); weight: (C, 1, 3, 3) PyTorch depthwise layout; bias: (C,)."""
    B, N, C = x.shape
    H = W = int(math.sqrt(N))
    assert H * W == N, "PosCNN expects a square token grid"
    assert weight.shape == (C, 1, 3, 3)

    # (C, 1, 3, 3) -> (9, C): tap-major rows, channels on the lane axis.
    w9 = jnp.transpose(weight[:, 0, :, :], (1, 2, 0)).reshape(9, C)
    b2 = bias.reshape(1, C)

    xs = x.reshape(B, H, W, C)        # free reshape: tokens are row-major H x W

    TC = _pick_channel_tile(C, H, W, jnp.dtype(x.dtype).itemsize)
    nct = C // TC

    kernel = functools.partial(_dwconv3x3_kernel, residual=(s == 1))
    y = pl.pallas_call(
        kernel,
        out_shape=jax.ShapeDtypeStruct((B, H, W, C), x.dtype),
        grid=(B, nct),
        in_specs=[
            pl.BlockSpec((1, H, W, TC), lambda b, c: (b, 0, 0, c)),
            pl.BlockSpec((9, TC), lambda b, c: (0, c)),
            pl.BlockSpec((1, TC), lambda b, c: (0, c)),
        ],
        out_specs=pl.BlockSpec((1, H, W, TC), lambda b, c: (b, 0, 0, c)),
        scratch_shapes=[pltpu.VMEM((H + 2, W + 2, TC), x.dtype)],
        compiler_params=pltpu.CompilerParams(
            dimension_semantics=("parallel", "parallel")),
    )(xs, w9, b2)

    if s != 1:
        # conv(3x3, pad=1, stride=s) == stride-1 conv subsampled at [::s, ::s]
        # (and PosCNN adds no residual in this branch).
        # TODO(synk): compute only the strided output rows in-kernel for large s.
        y = y[:, ::s, ::s, :]
    return y.reshape(B, -1, C)


# ----------------------------------------------------------------------------
# Pure-JAX reference mirroring the PyTorch ops literally (for validation)
# ----------------------------------------------------------------------------
def reference_forward(x, weight, bias, *, s=1):
    B, N, C = x.shape
    H = W = int(math.sqrt(N))
    cnn = jnp.transpose(x, (0, 2, 1)).reshape(B, C, H, W)
    y = lax.conv_general_dilated(
        cnn, weight, window_strides=(s, s), padding=((1, 1), (1, 1)),
        dimension_numbers=("NCHW", "OIHW", "NCHW"), feature_group_count=C)
    y = y + bias[None, :, None, None]
    if s == 1:
        y = y + cnn
    return y.reshape(B, C, -1).transpose(0, 2, 1)


if __name__ == "__main__":
    B, C, H, W, s = 2, 128, 8, 8, 1
    N = H * W

    key = jax.random.PRNGKey(0)
    kx, kw, kb = jax.random.split(key, 3)
    x = jax.random.normal(kx, (B, N, C), jnp.float32)
    weight = 0.1 * jax.random.normal(kw, (C, 1, 3, 3), jnp.float32)  # PyTorch layout
    bias = 0.1 * jax.random.normal(kb, (C,), jnp.float32)

    out = pos_cnn_forward(x, weight, bias, s=s)
    out = jax.block_until_ready(out)

    ref = reference_forward(x, weight, bias, s=s)
    assert out.shape == ref.shape == (B, N, C)
    max_err = float(jnp.max(jnp.abs(out - ref)))
    assert max_err < 1e-4, f"mismatch vs reference: {max_err}"

    print("KERNEL_OK")
</pallas_src>

<mosaic_0001>
module attributes {stable_mosaic.version = 11 : i64} {
  func.func @_dwconv3x3_kernel(%arg0: i32, %arg1: i32, %arg2: memref<1x8x8x128xf32, #tpu.memory_space<vmem>>, %arg3: memref<9x128xf32, #tpu.memory_space<vmem>>, %arg4: memref<1x128xf32, #tpu.memory_space<vmem>>, %arg5: memref<1x8x8x128xf32, #tpu.memory_space<vmem>>, %arg6: memref<10x10x128xf32, #tpu.memory_space<vmem>>) attributes {dimension_semantics = [#tpu.dimension_semantics<parallel>, #tpu.dimension_semantics<parallel>], iteration_bounds = array<i64: 2, 1>, scalar_prefetch = 0 : i64, scratch_operands = 1 : i64, tpu.core_type = #tpu.core_type<tc>, window_params = [{transform_indices = @transform_0, window_bounds = array<i64: 1, 8, 8, 128>}, {transform_indices = @transform_1, window_bounds = array<i64: 9, 128>}, {transform_indices = @transform_2, window_bounds = array<i64: 1, 128>}, {transform_indices = @transform_3, window_bounds = array<i64: 1, 8, 8, 128>}]} {
    %cst = arith.constant 0.000000e+00 : f32
    %0 = vector.broadcast %cst : f32 to vector<1x10x128xf32>
    %c0 = arith.constant 0 : index
    %c0_0 = arith.constant 0 : index
    %c0_1 = arith.constant 0 : index
    %1 = vector.load %arg6[%c0, %c0_0, %c0_1] : memref<10x10x128xf32, #tpu.memory_space<vmem>>, vector<1x10x128xf32>
    tpu.vector_store %arg6[%c0, %c0_0, %c0_1], %0 {strides = array<i32>} : memref<10x10x128xf32, #tpu.memory_space<vmem>>, vector<1x10x128xf32>,
    %cst_2 = arith.constant 0.000000e+00 : f32
    %2 = vector.broadcast %cst_2 : f32 to vector<1x10x128xf32>
    %c9 = arith.constant 9 : index
    %c0_3 = arith.constant 0 : index
    %c0_4 = arith.constant 0 : index
    %3 = vector.load %arg6[%c9, %c0_3, %c0_4] : memref<10x10x128xf32, #tpu.memory_space<vmem>>, vector<1x10x128xf32>
    tpu.vector_store %arg6[%c9, %c0_3, %c0_4], %2 {strides = array<i32>} : memref<10x10x128xf32, #tpu.memory_space<vmem>>, vector<1x10x128xf32>,
    %cst_5 = arith.constant 0.000000e+00 : f32
    %4 = vector.broadcast %cst_5 : f32 to vector<10x1x128xf32>
    %c0_6 = arith.constant 0 : index
    %c0_7 = arith.constant 0 : index
    %c0_8 = arith.constant 0 : index
    %5 = vector.load %arg6[%c0_6, %c0_7, %c0_8] : memref<10x10x128xf32, #tpu.memory_space<vmem>>, vector<10x1x128xf32>
    tpu.vector_store %arg6[%c0_6, %c0_7, %c0_8], %4 {strides = array<i32>} : memref<10x10x128xf32, #tpu.memory_space<vmem>>, vector<10x1x128xf32>,
    %cst_9 = arith.constant 0.000000e+00 : f32
    %6 = vector.broadcast %cst_9 : f32 to vector<10x1x128xf32>
    %c0_10 = arith.constant 0 : index
    %c9_11 = arith.constant 9 : index
    %c0_12 = arith.constant 0 : index
    %7 = vector.load %arg6[%c0_10, %c9_11, %c0_12] : memref<10x10x128xf32, #tpu.memory_space<vmem>>, vector<10x1x128xf32>
    tpu.vector_store %arg6[%c0_10, %c9_11, %c0_12], %6 {strides = array<i32>} : memref<10x10x128xf32, #tpu.memory_space<vmem>>, vector<10x1x128xf32>,
    %c0_13 = arith.constant 0 : index
    %c0_14 = arith.constant 0 : index
    %c0_15 = arith.constant 0 : index
    %c0_16 = arith.constant 0 : index
    %8 = vector.load %arg2[%c0_13, %c0_14, %c0_15, %c0_16] : memref<1x8x8x128xf32, #tpu.memory_space<vmem>>, vector<1x8x8x128xf32>
    %9 = vector.shape_cast %8 : vector<1x8x8x128xf32> to vector<8x8x128xf32>
    %c1 = arith.constant 1 : index
    %c1_17 = arith.constant 1 : index
    %c0_18 = arith.constant 0 : index
    %10 = vector.load %arg6[%c1, %c1_17, %c0_18] : memref<10x10x128xf32, #tpu.memory_space<vmem>>, vector<8x8x128xf32>
    tpu.vector_store %arg6[%c1, %c1_17, %c0_18], %9 {strides = array<i32>} : memref<10x10x128xf32, #tpu.memory_space<vmem>>, vector<8x8x128xf32>,
    %c0_19 = arith.constant 0 : index
    %c0_20 = arith.constant 0 : index
    %11 = vector.load %arg3[%c0_19, %c0_20] : memref<9x128xf32, #tpu.memory_space<vmem>>, vector<9x128xf32>
    %cst_21 = arith.constant 0.000000e+00 : f32
    %12 = vector.broadcast %cst_21 : f32 to vector<8x8x128xf32>
    %c0_22 = arith.constant 0 : index
    %c0_23 = arith.constant 0 : index
    %c0_24 = arith.constant 0 : index
    %13 = vector.load %arg6[%c0_22, %c0_23, %c0_24] : memref<10x10x128xf32, #tpu.memory_space<vmem>>, vector<8x8x128xf32>
    %14 = vector.extract_strided_slice %11 {offsets = [0, 0], sizes = [1, 128], strides = [1, 1]} : vector<9x128xf32> to vector<1x128xf32>
    %15 = vector.shape_cast %14 : vector<1x128xf32> to vector<1x1x128xf32>
    %16 = vector.broadcast %15 : vector<1x1x128xf32> to vector<8x8x128xf32>
    %17 = arith.mulf %13, %16 : vector<8x8x128xf32>
    %18 = arith.addf %12, %17 : vector<8x8x128xf32>
    %c0_25 = arith.constant 0 : index
    %c1_26 = arith.constant 1 : index
    %c0_27 = arith.constant 0 : index
    %19 = vector.load %arg6[%c0_25, %c1_26, %c0_27] : memref<10x10x128xf32, #tpu.memory_space<vmem>>, vector<8x8x128xf32>
    %20 = vector.extract_strided_slice %11 {offsets = [1, 0], sizes = [1, 128], strides = [1, 1]} : vector<9x128xf32> to vector<1x128xf32>
    %21 = vector.shape_cast %20 : vector<1x128xf32> to vector<1x1x128xf32>
    %22 = vector.broadcast %21 : vector<1x1x128xf32> to vector<8x8x128xf32>
    %23 = arith.mulf %19, %22 : vector<8x8x128xf32>
    %24 = arith.addf %18, %23 : vector<8x8x128xf32>
    %c0_28 = arith.constant 0 : index
    %c2 = arith.constant 2 : index
    %c0_29 = arith.constant 0 : index
    %25 = vector.load %arg6[%c0_28, %c2, %c0_29] : memref<10x10x128xf32, #tpu.memory_space<vmem>>, vector<8x8x128xf32>
    %26 = vector.extract_strided_slice %11 {offsets = [2, 0], sizes = [1, 128], strides = [1, 1]} : vector<9x128xf32> to vector<1x128xf32>
    %27 = vector.shape_cast %26 : vector<1x128xf32> to vector<1x1x128xf32>
    %28 = vector.broadcast %27 : vector<1x1x128xf32> to vector<8x8x128xf32>
    %29 = arith.mulf %25, %28 : vector<8x8x128xf32>
    %30 = arith.addf %24, %29 : vector<8x8x128xf32>
    %c1_30 = arith.constant 1 : index
    %c0_31 = arith.constant 0 : index
    %c0_32 = arith.constant 0 : index
    %31 = vector.load %arg6[%c1_30, %c0_31, %c0_32] : memref<10x10x128xf32, #tpu.memory_space<vmem>>, vector<8x8x128xf32>
    %32 = vector.extract_strided_slice %11 {offsets = [3, 0], sizes = [1, 128], strides = [1, 1]} : vector<9x128xf32> to vector<1x128xf32>
    %33 = vector.shape_cast %32 : vector<1x128xf32> to vector<1x1x128xf32>
    %34 = vector.broadcast %33 : vector<1x1x128xf32> to vector<8x8x128xf32>
    %35 = arith.mulf %31, %34 : vector<8x8x128xf32>
    %36 = arith.addf %30, %35 : vector<8x8x128xf32>
    %c1_33 = arith.constant 1 : index
    %c1_34 = arith.constant 1 : index
    %c0_35 = arith.constant 0 : index
    %37 = vector.load %arg6[%c1_33, %c1_34, %c0_35] : memref<10x10x128xf32, #tpu.memory_space<vmem>>, vector<8x8x128xf32>
    %38 = vector.extract_strided_slice %11 {offsets = [4, 0], sizes = [1, 128], strides = [1, 1]} : vector<9x128xf32> to vector<1x128xf32>
    %39 = vector.shape_cast %38 : vector<1x128xf32> to vector<1x1x128xf32>
    %40 = vector.broadcast %39 : vector<1x1x128xf32> to vector<8x8x128xf32>
    %41 = arith.mulf %37, %40 : vector<8x8x128xf32>
    %42 = arith.addf %36, %41 : vector<8x8x128xf32>
    %c1_36 = arith.constant 1 : index
    %c2_37 = arith.constant 2 : index
    %c0_38 = arith.constant 0 : index
    %43 = vector.load %arg6[%c1_36, %c2_37, %c0_38] : memref<10x10x128xf32, #tpu.memory_space<vmem>>, vector<8x8x128xf32>
    %44 = vector.extract_strided_slice %11 {offsets = [5, 0], sizes = [1, 128], strides = [1, 1]} : vector<9x128xf32> to vector<1x128xf32>
    %45 = vector.shape_cast %44 : vector<1x128xf32> to vector<1x1x128xf32>
    %46 = vector.broadcast %45 : vector<1x1x128xf32> to vector<8x8x128xf32>
    %47 = arith.mulf %43, %46 : vector<8x8x128xf32>
    %48 = arith.addf %42, %47 : vector<8x8x128xf32>
    %c2_39 = arith.constant 2 : index
    %c0_40 = arith.constant 0 : index
    %c0_41 = arith.constant 0 : index
    %49 = vector.load %arg6[%c2_39, %c0_40, %c0_41] : memref<10x10x128xf32, #tpu.memory_space<vmem>>, vector<8x8x128xf32>
    %50 = vector.extract_strided_slice %11 {offsets = [6, 0], sizes = [1, 128], strides = [1, 1]} : vector<9x128xf32> to vector<1x128xf32>
    %51 = vector.shape_cast %50 : vector<1x128xf32> to vector<1x1x128xf32>
    %52 = vector.broadcast %51 : vector<1x1x128xf32> to vector<8x8x128xf32>
    %53 = arith.mulf %49, %52 : vector<8x8x128xf32>
    %54 = arith.addf %48, %53 : vector<8x8x128xf32>
    %c2_42 = arith.constant 2 : index
    %c1_43 = arith.constant 1 : index
    %c0_44 = arith.constant 0 : index
    %55 = vector.load %arg6[%c2_42, %c1_43, %c0_44] : memref<10x10x128xf32, #tpu.memory_space<vmem>>, vector<8x8x128xf32>
    %56 = vector.extract_strided_slice %11 {offsets = [7, 0], sizes = [1, 128], strides = [1, 1]} : vector<9x128xf32> to vector<1x128xf32>
    %57 = vector.shape_cast %56 : vector<1x128xf32> to vector<1x1x128xf32>
    %58 = vector.broadcast %57 : vector<1x1x128xf32> to vector<8x8x128xf32>
    %59 = arith.mulf %55, %58 : vector<8x8x128xf32>
    %60 = arith.addf %54, %59 : vector<8x8x128xf32>
    %c2_45 = arith.constant 2 : index
    %c2_46 = arith.constant 2 : index
    %c0_47 = arith.constant 0 : index
    %61 = vector.load %arg6[%c2_45, %c2_46, %c0_47] : memref<10x10x128xf32, #tpu.memory_space<vmem>>, vector<8x8x128xf32>
    %62 = vector.extract_strided_slice %11 {offsets = [8, 0], sizes = [1, 128], strides = [1, 1]} : vector<9x128xf32> to vector<1x128xf32>
    %63 = vector.shape_cast %62 : vector<1x128xf32> to vector<1x1x128xf32>
    %64 = vector.broadcast %63 : vector<1x1x128xf32> to vector<8x8x128xf32>
    %65 = arith.mulf %61, %64 : vector<8x8x128xf32>
    %66 = arith.addf %60, %65 : vector<8x8x128xf32>
    %c0_48 = arith.constant 0 : index
    %c0_49 = arith.constant 0 : index
    %67 = vector.load %arg4[%c0_48, %c0_49] : memref<1x128xf32, #tpu.memory_space<vmem>>, vector<1x128xf32>
    %68 = vector.shape_cast %67 : vector<1x128xf32> to vector<1x1x128xf32>
    %69 = vector.broadcast %68 : vector<1x1x128xf32> to vector<8x8x128xf32>
    %70 = arith.addf %66, %69 : vector<8x8x128xf32>
    %71 = arith.addf %70, %9 : vector<8x8x128xf32>
    %c0_50 = arith.constant 0 : index
    %c0_51 = arith.constant 0 : index
    %c0_52 = arith.constant 0 : index
    %c0_53 = arith.constant 0 : index
    %72 = vector.load %arg5[%c0_50, %c0_51, %c0_52, %c0_53] : memref<1x8x8x128xf32, #tpu.memory_space<vmem>>, vector<1x8x8x128xf32>
    %73 = vector.shape_cast %72 : vector<1x8x8x128xf32> to vector<8x8x128xf32>
    %74 = vector.shape_cast %71 : vector<8x8x128xf32> to vector<1x8x8x128xf32>
    tpu.vector_store %arg5[%c0_50, %c0_51, %c0_52, %c0_53], %74 {strides = array<i32>} : memref<1x8x8x128xf32, #tpu.memory_space<vmem>>, vector<1x8x8x128xf32>,
    return
  }
  func.func @transform_0(%arg0: i32, %arg1: i32) -> (i32, i32, i32, i32) {
    %c0_i32 = arith.constant 0 : i32
    %c0_i32_0 = arith.constant 0 : i32
    %c0_i32_1 = arith.constant 0 : i32
    return %arg0, %c0_i32, %c0_i32_0, %arg1 : i32, i32, i32, i32
  }
  func.func @transform_1(%arg0: i32, %arg1: i32) -> (i32, i32) {
    %c0_i32 = arith.constant 0 : i32
    %c0_i32_0 = arith.constant 0 : i32
    return %c0_i32, %arg1 : i32, i32
  }
  func.func @transform_2(%arg0: i32, %arg1: i32) -> (i32, i32) {
    %c0_i32 = arith.constant 0 : i32
    %c0_i32_0 = arith.constant 0 : i32
    return %c0_i32, %arg1 : i32, i32
  }
  func.func @transform_3(%arg0: i32, %arg1: i32) -> (i32, i32, i32, i32) {
    %c0_i32 = arith.constant 0 : i32
    %c0_i32_0 = arith.constant 0 : i32
    %c0_i32_1 = arith.constant 0 : i32
    return %arg0, %c0_i32, %c0_i32_0, %arg1 : i32, i32, i32, i32
  }
}

</mosaic_0001>

<bundles_post_ra>
// kernel: tpu_custom_call.1
= control target key start
LH: loop header
LB: loop body
LE: loop exit
PB: predicated region body
PF: predicated region fallthrough
CT: control target
= control target key end

     0   :  { %s1326_s0 = inlined_call_operand.hbm [shape: f32[2,8,8,128], index: 0, kind: input, shape index: {}]   ;;  %s1327_s1 = inlined_call_operand.hbm [shape: f32[9,128], index: 1, kind: input, shape index: {}]   ;;  %s1328_s2 = inlined_call_operand.vmem [shape: f32[1,128], index: 2, kind: input, shape index: {}]   ;;  %s1329_s3 = inlined_call_operand.hbm [shape: f32[2,8,8,128], index: 3, kind: output, shape index: {}]  }
   0x1   :  { %1331 = sst [smem:[#allocation12_spill]] %s1327_s1 }
   0x2   :  { %8 = vsyncpa [#allocation4], 0 }
   0x3   :  { %10 = vsyncpa [#allocation4 + $0x1], 0 }
   0x4   :  { %11 = vsyncpa [#allocation7], 0 }
   0x5   :  { %12 = vsyncpa [#allocation5], 0 }
   0x6   :  { %14 = vsyncpa [#allocation5 + $0x1], 0  ;;  %s944_s12 = smov 0   ;;  %s946_s13 = smov 0  }
   0x7   :  { %s948_s14 = smov 0   ;;  %s950_s15 = smov 0  }
   0x8   :  { %s952_s16 = smov 0   ;;  %s954_s17 = smov 0  }
   0x9 LB: > { %s670_s18 = sadd.s32 4294967295, %s916_s17   ;;  %s671_s19 = sadd.s32 4294967294, %s916_s17   ;;  %s916_s17 = sphi %s954_s17, %s20_s17   ;;  %s912_s16 = sphi %s952_s16, %s1345_s16   ;;  %s908_s15 = sphi %s950_s15, %s1344_s15   ;;  %s904_s14 = sphi %s948_s14, %s1343_s14   ;;  %s900_s13 = sphi %s946_s13, %s1342_s13   ;;  %s896_s12 = sphi %s944_s12, %s1341_s12  }
   0xa   : > { %p54_p0 = scmp.ne.s32.totalorder %s900_s13, %s896_s12  ;;  %p978_p1 = scmp.eq.s32.totalorder %s670_s18, 0 }
   0xb   : > { %p982_p2 = scmp.eq.s32.totalorder %s670_s18, 1  ;;  %p138_p3 = scmp.eq.s32.totalorder %s671_s19, 1 }
   0xc   : > { %p988_p4 = por %p978_p1, %p54_p0  ;;  %p672_p5 = scmp.ge.s32.totalorder %s916_s17, 1 }
   0xd   : > { %p993_p6 = por %p138_p3, %p54_p0  ;;  %p145_p7 = scmp.lt.s32.totalorder %s916_s17, 3 }
   0xe   : > { %s1336_s1 = sld [smem:[#allocation12_spill]]  ;;  %s918_s28 = smov [#allocation6]  }
   0xf   : > { %p1001_p8 = pnand %p672_p5, %p145_p7  ;;  %s160_s29 = sshll.u32 %s918_s28, 4  ;;  %s161_s29 = int_to_ptr.vmem [resolvable:$true] %s160_s29 }
  0x10   : > { %p675_p11 = scmp.ge.s32.totalorder %s916_s17, 2  ;;  %s1330_s30 = smov 128  }
  0x11   : > { %p698_p9 = pneg %p1001_p8  ;;  %s920_s4 = smov 8  }
  0x12   : > { %s32_s5 = sadd.s32 1, %s912_s16  ;;  %s41_s6 = sadd.s32 1, %s904_s14 }
  0x13   : > { %p699_p10 = pnand %p698_p9, %p978_p1  ;;  %p34_p12 = scmp.ge.s32.totalorder %s32_s5, 2 }
  0x14   : > { %s158_s26 = sshll.u32 %s1336_s1, 4  ;;  %p48_p13 = scmp.ne.s32.totalorder %s904_s14, %s900_s13  ;;  %s159_s26 = int_to_ptr.hbm [resolvable:$true] %s158_s26 }
  0x15   : > { %701 = dma.hbm_to_vmem [thread:$0]  (!%p699_p10), %s159_s26, 256, %s161_s29, [#allocation7], %s1330_s30, %s1330_s30, %s920_s4  }
  0x16   : > { %p49_p0 = scmp.eq.s32.totalorder %s916_s17, 0  ;;  %s1347_s5 = smov (%p34_p12, %s32_s5), 0 }
  0x17   : > { %p1026_p5 = por %p982_p2, %p48_p13  ;;  %s36_s9 = ssub.s32 %s912_s16, %s1347_s5 }
  0x18   : > { %p1020_p3 = por %p49_p0, %p48_p13  ;;  %p711_p7 = scmp.lt.s32.totalorder %s916_s17, 2 }
  0x19   : > { %p39_p9 = scmp.eq.s32.totalorder %s36_s9, 0  ;;  %s180_s10 = sand.u32 1, %s904_s14  }
  0x1a   : > { %s676_s11 = sshll.u32 %s180_s10, 6  ;;  %s688_s19 = sshll.u32 %s912_s16, 6 }
  0x1b   : > { %s1035_s18 = scalar_select %p39_p9, %s904_s14, %s41_s6  }
  0x1c   : > { %s190_s26 = scalar_lea.hbm %s1326_s0, %s688_s19  ;;  %s184_s28 = scalar_lea.vmem [#allocation3], %s676_s11 }
  0x1d   : > { %s193_s29 = sshll.u32 %s184_s28, 4  ;;  %s191_s21 = sshll.u32 %s190_s26, 4  ;;  %s194_s29 = int_to_ptr.vmem [resolvable:$true] %s193_s29  ;;  %s192_s21 = int_to_ptr.hbm [resolvable:$true] %s191_s21 }
  0x1e   : > { %p703_p2 = pnand %p711_p7, %p1020_p3  ;;  %s181_s30 = scalar_lea.sflag [#allocation4], %s180_s10 }
  0x1f   : > { %s1340_s1 = smov 128   ;;  %205 = sbr.rel (%p1001_p8) target bundleno = 120 (0x78), region = 32 }
  0x20   : > { %705 = dma.hbm_to_vmem [thread:$0]  (!%p703_p2), %s192_s21, 1024, %s194_s29, %s181_s30, %s1340_s1, %s1340_s1, %s920_s4  }
  0x21   : > { %s1049_s6 = sand.u32 (!%p1001_p8), 1, %s900_s13  }
  0x22   : > { %s680_s9 = sshll.u32 (!%p1001_p8), %s1049_s6, 6  ;;  %s208_s11 = scalar_lea.sflag (!%p1001_p8), [#allocation4], %s1049_s6 }
  0x23   : > { %s1055_s7 = scalar_lea.vmem (!%p1001_p8), [#allocation3], %s680_s9 }
  0x24   : > { %883 = dma.done.wait (%p988_p4), %s208_s11, 1024  }
  0x25   : > { %885 = vsyncadd (%p988_p4), %s208_s11, 4294966272 }
  0x26   : > { %887 = dma.done.wait (%p978_p1), [#allocation7], 256  }
  0x27   : > { %889 = vsyncadd (%p978_p1), [#allocation7], 4294967040  ;;  %v921_v0 = vmov 0.0   ;;  %v288_v1 = vld [vmem:[#allocation6] sm:$0xff]  ;;  %v1073_v7 = vld [vmem:[%s1055_s7 + $0x8] sm:$0xff]  ;;  %s1236_s22 = scalar_lea.vmem [#allocation8], %s680_s9 }
  0x28   : > { %246 = vst [vmem:[#allocation2] sm:$0xff] %v921_v0  ;;  %v1065_v2 = vperm.slane %v288_v1, 0  ;;  %v1067_v3 = vperm.slane %v288_v1, 1  ;;  %v1070_v4 = vld [vmem:[%s1055_s7] sm:$0xff]  ;;  %v1076_v8 = vld [vmem:[%s1055_s7 + $0x10] sm:$0xff]  ;;  %v1078_v9 = vperm.slane %v288_v1, 4 }
  0x29   : > { %247 = vst [vmem:[#allocation2 + $0x8] sm:$0x3] %v921_v0  ;;  %v1082_v10 = vld [vmem:[%s1055_s7 + $0x18] sm:$0xff]  ;;  %v1086_v13 = vperm.slane %v288_v1, 7  ;;  %v1090_v14 = vld [vmem:[%s1055_s7 + $0x20] sm:$0xff]  ;;  %v1094_v15 = vld [vmem:[%s1055_s7 + $0x28] sm:$0xff] }
  0x2a   : > { %249 = vst [vmem:[#allocation2 + $0x90] sm:$0xff] %v921_v0  ;;  %v1096_v16 = vperm.slane %v288_v1, 2  ;;  %v1098_v17 = vperm.slane %v288_v1, 3  ;;  %v1102_v18 = vld [vmem:[%s1055_s7 + $0x30] sm:$0xff]  ;;  %v399_v19 = vmul.f32 %v1078_v9, %v1070_v4  ;;  %v1106_v20 = vperm.slane %v288_v1, 5  ;;  %v1114_v23 = vld [vmem:[%s1055_s7 + $0x38] sm:$0xff] }
  0x2b   : > { %250 = vst [vmem:[#allocation2 + $0x98] sm:$0x3] %v921_v0  ;;  %v1108_v21 = vperm.slane %v288_v1, 6  ;;  %v325_v22 = vmul.f32 %v1067_v3, %v1070_v4  ;;  %v1118_v25 = vmul.f32 %v1086_v13, %v1073_v7  ;;  %v400_v26 = vmul.f32 %v1078_v9, %v1073_v7  ;;  %v1154_v39 = vld [vmem:[#allocation6 + $0x8] ss:$0 sm:$0xff]  ;;  %s689_s27 = sshll.u32 %s908_s15, 6 }
  0x2c   : > { %251 = vst [vmem:[#allocation2] sm:$0x1] %v921_v0  ;;  %v326_v27 = vmul.f32 %v1067_v3, %v1073_v7  ;;  %v1127_v29 = vmul.f32 %v1078_v9, %v1076_v8  ;;  %v327_v30 = vmul.f32 %v1067_v3, %v1076_v8  ;;  %v1133_v31 = vmul.f32 %v1078_v9, %v1082_v10  ;;  %s557_s10 = scalar_lea.hbm %s1329_s3, %s689_s27  ;;  %s558_s19 = sshll.u32 %s1236_s22, 4  ;;  %s559_s19 = int_to_ptr.vmem [resolvable:$true] %s558_s19 }
  0x2d   : > { %252 = vst [vmem:[#allocation2 + $0x10] sm:$0x1] %v921_v0  ;;  %v1137_v32 = vmul.f32 %v1067_v3, %v1082_v10  ;;  %v1143_v34 = vmul.f32 %v1078_v9, %v1090_v14  ;;  %v1147_v35 = vmul.f32 %v1067_v3, %v1090_v14  ;;  %v1151_v36 = vmul.f32 %v1067_v3, %v1094_v15  ;;  %s560_s15 = sshll.u32 %s557_s10, 4  ;;  %s545_s24 = scalar_lea.sflag [#allocation5], %s1049_s6  ;;  %s561_s15 = int_to_ptr.hbm [resolvable:$true] %s560_s15 }
  0x2e   : > { %253 = vst [vmem:[#allocation2 + $0x20] sm:$0x1] %v921_v0  ;;  %v1158_v40 = vmul.f32 %v1086_v13, %v1076_v8  ;;  %v1162_v41 = vmul.f32 %v1086_v13, %v1082_v10  ;;  %v1166_v42 = vmul.f32 %v1086_v13, %v1090_v14  ;;  %v1170_v43 = vmul.f32 %v1078_v9, %v1094_v15  ;;  %s844_s25 = sshra.s32 %s561_s15, 4  ;;  %s850_s21 = scalar_lea.hbm %s1329_s3, 128  ;;  %s845_s25 = int_to_ptr.hbm [resolvable:$true] %s844_s25 }
  0x2f   : > { %254 = vst [vmem:[#allocation2 + $0x30] sm:$0x1] %v921_v0  ;;  %v1176_v49 = vmul.f32 %v1086_v13, %v1094_v15  ;;  %v1181_v53 = vmul.f32 %v1086_v13, %v1102_v18  ;;  %v1185_v54 = vmul.f32 %v1078_v9, %v1102_v18  ;;  %v1189_v55 = vmul.f32 %v1067_v3, %v1102_v18  ;;  %s846_s26 = scalar_lea.hbm %s845_s25, 64  ;;  %p851_p10 = scmp.lt.s32.totalorder %s845_s25, %s1329_s3 }
  0x30   : > { %255 = vst [vmem:[#allocation2 + $0x40] sm:$0x1] %v921_v0  ;;  %v315_v6 = vld [vmem:[#allocation2 + $0x1] sm:$0xff]  ;;  %p847_p1 = scmp.ne.s32.totalorder %s845_s25, %s846_s26  ;;  %p852_p12 = scmp.lt.s32.totalorder %s850_s21, %s846_s26 }
  0x31   : > { %256 = vst [vmem:[#allocation2 + $0x50] sm:$0x1] %v921_v0  ;;  %v324_v12 = vmul.f32 %v1067_v3, %v315_v6 }
  0x32   : > { %257 = vst [vmem:[#allocation2 + $0x60] sm:$0x1] %v921_v0  ;;  %p848_p4 = pnand %p847_p1, %p1026_p5  ;;  %p853_p13 = por %p852_p12, %p851_p10 }
  0x33   : > { %258 = vst [vmem:[#allocation2 + $0x70] sm:$0x1] %v921_v0  ;;  %v290_v5 = vld [vmem:[#allocation2] sm:$0xff] }
  0x34   : > { %259 = vst [vmem:[#allocation2 + $0x80] sm:$0x1] %v921_v0  ;;  %v299_v11 = vmul.f32 %v1065_v2, %v290_v5  ;;  %p849_p8 = pneg %p848_p4 }
  0x35   : > { %262 = vst [vmem:[#allocation2 + $0x19] sm:$0x1] %v921_v0 }
  0x36   : > { %263 = vst [vmem:[#allocation2 + $0x29] sm:$0x1] %v921_v0  ;;  %v332_v24 = vadd.f32 %v324_v12, %v299_v11  ;;  %p854_p0 = pnand %p853_p13, %p849_p8 }
  0x37   : > { %264 = vst [vmem:[#allocation2 + $0x39] sm:$0x1] %v921_v0 }
  0x38   : > { %265 = vst [vmem:[#allocation2 + $0x49] sm:$0x1] %v921_v0 }
  0x39   : > { %266 = vst [vmem:[#allocation2 + $0x59] sm:$0x1] %v921_v0 }
  0x3a   : > { %267 = vst [vmem:[#allocation2 + $0x69] sm:$0x1] %v921_v0 }
  0x3b   : > { %268 = vst [vmem:[#allocation2 + $0x79] sm:$0x1] %v921_v0 }
  0x3c   : > { %269 = vst [vmem:[#allocation2 + $0x89] sm:$0x1] %v921_v0 }
  0x3d   : > { %260 = vst [vmem:[#allocation2 + $0x90] sm:$0x1] %v921_v0 }
  0x3e   : > { %261 = vst [vmem:[#allocation2 + $0x9] sm:$0x1] %v921_v0 }
  0x3f   : > { %270 = vst [vmem:[#allocation2 + $0x99] sm:$0x1] %v921_v0 }
  0x40   : > { %280 = vst [vmem:[#allocation2 + $0x11] sm:$0xff] %v1070_v4 }
  0x41   : > { %281 = vst [vmem:[#allocation2 + $0x21] sm:$0xff] %v1073_v7 }
  0x42   : > { %282 = vst [vmem:[#allocation2 + $0x31] sm:$0xff] %v1076_v8 }
  0x43   : > { %283 = vst [vmem:[#allocation2 + $0x41] sm:$0xff] %v1082_v10 }
  0x44   : > { %284 = vst [vmem:[#allocation2 + $0x51] sm:$0xff] %v1090_v14 }
  0x45   : > { %285 = vst [vmem:[#allocation2 + $0x61] sm:$0xff] %v1094_v15  ;;  %v340_v28 = vld [vmem:[#allocation2 + $0x2] sm:$0xff] }
  0x46   : > { %286 = vst [vmem:[#allocation2 + $0x71] sm:$0xff] %v1102_v18  ;;  %v349_v33 = vmul.f32 %v1096_v16, %v340_v28 }
  0x47   : > { %287 = vst [vmem:[#allocation2 + $0x81] sm:$0xff] %v1114_v23  ;;  %v365_v37 = vld [vmem:[#allocation2 + $0x10] sm:$0xff] }
  0x48   : > { %v415_v38 = vld [vmem:[#allocation2 + $0x12] sm:$0xff]  ;;  %v357_v44 = vadd.f32 %v349_v33, %v332_v24  ;;  %v374_v45 = vmul.f32 %v1098_v17, %v365_v37  ;;  %v441_v46 = vld [vmem:[#allocation2 + $0x20] sm:$0xff]  ;;  %v300_v48 = vmul.f32 %v365_v37, %v1065_v2 }
  0x49   : > { %v491_v47 = vld [vmem:[#allocation2 + $0x22] sm:$0xff]  ;;  %v424_v50 = vmul.f32 %v1106_v20, %v415_v38  ;;  %v442_v51 = vld [vmem:[#allocation2 + $0x30] sm:$0xff]  ;;  %v450_v57 = vmul.f32 %v1108_v21, %v441_v46  ;;  %v350_v59 = vmul.f32 %v415_v38, %v1096_v16  ;;  %v375_v61 = vmul.f32 %v441_v46, %v1098_v17 }
  0x4a   : > { %v492_v52 = vld [vmem:[#allocation2 + $0x32] sm:$0xff]  ;;  %v382_v56 = vadd.f32 %v374_v45, %v357_v44  ;;  %v333_v58 = vadd.f32 %v325_v22, %v300_v48  ;;  %v500_v60 = vmul.f32 %v1154_v39, %v491_v47  ;;  %v425_v62 = vmul.f32 %v491_v47, %v1106_v20  ;;  %v443_v0 = vld [vmem:[#allocation2 + $0x40] sm:$0xff] }
  0x4b   : > { %v301_v63 = vmul.f32 %v441_v46, %v1065_v2  ;;  %v451_v3 = vmul.f32 %v1108_v21, %v442_v51  ;;  %v501_v6 = vmul.f32 %v1154_v39, %v492_v52  ;;  %v493_v11 = vld [vmem:[#allocation2 + $0x42] sm:$0xff]  ;;  %v351_v22 = vmul.f32 %v491_v47, %v1096_v16 }
  0x4c   : > { %v407_v1 = vadd.f32 %v399_v19, %v382_v56  ;;  %v358_v5 = vadd.f32 %v350_v59, %v333_v58  ;;  %v376_v24 = vmul.f32 %v442_v51, %v1098_v17  ;;  %v302_v28 = vmul.f32 %v442_v51, %v1065_v2  ;;  %v444_v19 = vld [vmem:[#allocation2 + $0x50] sm:$0xff] }
  0x4d   : > { %v334_v12 = vadd.f32 %v326_v27, %v301_v63  ;;  %v426_v38 = vmul.f32 %v492_v52, %v1106_v20  ;;  %v452_v44 = vmul.f32 %v1108_v21, %v443_v0  ;;  %v502_v46 = vmul.f32 %v1154_v39, %v493_v11  ;;  %v494_v59 = vld [vmem:[#allocation2 + $0x52] sm:$0xff] }
  0x4e   : > { %v432_v33 = vadd.f32 %v424_v50, %v407_v1  ;;  %v383_v37 = vadd.f32 %v375_v61, %v358_v5  ;;  %v335_v48 = vadd.f32 %v327_v30, %v302_v28  ;;  %v352_v56 = vmul.f32 %v492_v52, %v1096_v16  ;;  %v1214_v30 = vld [vmem:[%s1328_s2] ss:$0 sm:$0xff] }
  0x4f   : > { %v359_v45 = vadd.f32 %v351_v22, %v334_v12  ;;  %v377_v47 = vmul.f32 %v443_v0, %v1098_v17  ;;  %v303_v51 = vmul.f32 %v443_v0, %v1065_v2  ;;  %v427_v63 = vmul.f32 %v493_v11, %v1106_v20 }
  0x50   : > { %v458_v27 = vadd.f32 %v450_v57, %v432_v33  ;;  %v408_v58 = vadd.f32 %v400_v26, %v383_v37  ;;  %v360_v61 = vadd.f32 %v352_v56, %v335_v48  ;;  %v453_v1 = vmul.f32 %v1108_v21, %v444_v19 }
  0x51   : > { %v384_v50 = vadd.f32 %v376_v24, %v359_v45  ;;  %v336_v26 = vadd.f32 %v1137_v32, %v303_v51  ;;  %v353_v57 = vmul.f32 %v493_v11, %v1096_v16  ;;  %v503_v22 = vmul.f32 %v1154_v39, %v494_v59  ;;  %v445_v45 = vld [vmem:[#allocation2 + $0x60] sm:$0xff] }
  0x52   : > { %v483_v5 = vadd.f32 %v1118_v25, %v458_v27  ;;  %v433_v52 = vadd.f32 %v425_v62, %v408_v58  ;;  %v385_v12 = vadd.f32 %v377_v47, %v360_v61  ;;  %v304_v24 = vmul.f32 %v444_v19, %v1065_v2  ;;  %v495_v47 = vld [vmem:[#allocation2 + $0x62] sm:$0xff] }
  0x53   : > { %v409_v0 = vadd.f32 %v1127_v29, %v384_v50  ;;  %v361_v25 = vadd.f32 %v353_v57, %v336_v26  ;;  %v378_v37 = vmul.f32 %v444_v19, %v1098_v17  ;;  %v354_v11 = vmul.f32 %v494_v59, %v1096_v16  ;;  %v496_v26 = vld [vmem:[#allocation2 + $0x72] sm:$0xff] }
  0x54   : > { %v508_v28 = vadd.f32 %v500_v60, %v483_v5  ;;  %v459_v33 = vadd.f32 %v451_v3, %v433_v52  ;;  %v410_v62 = vadd.f32 %v1133_v31, %v385_v12  ;;  %v337_v32 = vadd.f32 %v1147_v35, %v304_v24  ;;  %v446_v52 = vld [vmem:[#allocation2 + $0x70] sm:$0xff] }
  0x55   : > { %v434_v48 = vadd.f32 %v426_v38, %v409_v0  ;;  %v386_v27 = vadd.f32 %v378_v37, %v361_v25  ;;  %v428_v60 = vmul.f32 %v494_v59, %v1106_v20  ;;  %v379_v38 = vmul.f32 %v445_v45, %v1098_v17 }
  0x56   : > { %v520_v29 = vadd.f32 %v1214_v30, %v508_v28  ;;  %v484_v56 = vadd.f32 %v1158_v40, %v459_v33  ;;  %v435_v58 = vadd.f32 %v427_v63, %v410_v62  ;;  %v362_v19 = vadd.f32 %v354_v11, %v337_v32 }
  0x57   : > { %v460_v3 = vadd.f32 %v452_v44, %v434_v48  ;;  %v411_v35 = vadd.f32 %v1143_v34, %v386_v27  ;;  %v454_v50 = vmul.f32 %v1108_v21, %v445_v45  ;;  %v305_v59 = vmul.f32 %v445_v45, %v1065_v2  ;;  %v447_v45 = vld [vmem:[#allocation2 + $0x80] sm:$0xff] }
  0x58   : > { %v528_v31 = vadd.f32 %v520_v29, %v1070_v4  ;;  %v509_v51 = vadd.f32 %v501_v6, %v484_v56  ;;  %v461_v40 = vadd.f32 %v453_v1, %v435_v58  ;;  %v387_v5 = vadd.f32 %v379_v38, %v362_v19 }
  0x59   : > { %v485_v61 = vadd.f32 %v1162_v41, %v460_v3  ;;  %v436_v4 = vadd.f32 %v428_v60, %v411_v35  ;;  %v429_v6 = vmul.f32 %v495_v47, %v1106_v20  ;;  %v355_v34 = vmul.f32 %v495_v47, %v1096_v16 }
  0x5a   : > { %536 = vst [vmem:[%s1236_s22] sm:$0xff] %v528_v31  ;;  %v521_v44 = vadd.f32 %v1214_v30, %v509_v51  ;;  %v486_v41 = vadd.f32 %v1166_v42, %v461_v40  ;;  %v412_v1 = vadd.f32 %v1170_v43, %v387_v5  ;;  %v338_v57 = vadd.f32 %v1151_v36, %v305_v59 }
  0x5b   : > { %v510_v63 = vadd.f32 %v502_v46, %v485_v61  ;;  %v462_v12 = vadd.f32 %v454_v50, %v436_v4  ;;  %v455_v24 = vmul.f32 %v1108_v21, %v446_v52  ;;  %v380_v28 = vmul.f32 %v446_v52, %v1098_v17 }
  0x5c   : > { %v529_v0 = vadd.f32 %v521_v44, %v1073_v7  ;;  %v511_v25 = vadd.f32 %v503_v22, %v486_v41  ;;  %v437_v37 = vadd.f32 %v429_v6, %v412_v1  ;;  %v363_v46 = vadd.f32 %v355_v34, %v338_v57  ;;  %v498_v44 = vld [vmem:[#allocation2 + $0x92] sm:$0xff] }
  0x5d   : > { %v522_v33 = vadd.f32 %v1214_v30, %v510_v63  ;;  %v487_v42 = vadd.f32 %v1176_v49, %v462_v12  ;;  %v504_v43 = vmul.f32 %v1154_v39, %v495_v47  ;;  %v505_v36 = vmul.f32 %v1154_v39, %v496_v26 }
  0x5e   : > { %537 = vst [vmem:[%s1236_s22 + $0x8] sm:$0xff] %v529_v0  ;;  %v306_v7 = vmul.f32 %v446_v52, %v1065_v2  ;;  %v523_v62 = vadd.f32 %v1214_v30, %v511_v25  ;;  %v463_v32 = vadd.f32 %v455_v24, %v437_v37  ;;  %v388_v22 = vadd.f32 %v380_v28, %v363_v46  ;;  %v473_v52 = vld [vmem:[#allocation2 + $0x91] sm:$0xff] }
  0x5f   : > { %v530_v48 = vadd.f32 %v522_v33, %v1076_v8  ;;  %v512_v11 = vadd.f32 %v504_v43, %v487_v42  ;;  %v356_v56 = vmul.f32 %v496_v26, %v1096_v16  ;;  %v381_v49 = vmul.f32 %v447_v45, %v1098_v17 }
  0x60   : > { %v339_v29 = vadd.f32 %v1189_v55, %v306_v7  ;;  %v531_v27 = vadd.f32 %v523_v62, %v1082_v10  ;;  %v488_v60 = vadd.f32 %v1181_v53, %v463_v32  ;;  %v413_v2 = vadd.f32 %v1185_v54, %v388_v22  ;;  %v497_v53 = vld [vmem:[#allocation2 + $0x82] sm:$0xff]  ;;  %v448_v54 = vld [vmem:[#allocation2 + $0x90] sm:$0xff] }
  0x61   : > { %538 = vst [vmem:[%s1236_s22 + $0x10] sm:$0xff] %v530_v48  ;;  %v430_v8 = vmul.f32 %v496_v26, %v1106_v20  ;;  %v524_v3 = vadd.f32 %v1214_v30, %v512_v11  ;;  %v406_v55 = vmul.f32 %v1078_v9, %v1114_v23  ;;  %v456_v17 = vmul.f32 %v1108_v21, %v447_v45 }
  0x62   : > { %v364_v58 = vadd.f32 %v356_v56, %v339_v29  ;;  %539 = vst [vmem:[%s1236_s22 + $0x18] sm:$0xff] %v531_v27  ;;  %v513_v16 = vadd.f32 %v505_v36, %v488_v60  ;;  %v481_v10 = vmul.f32 %v1086_v13, %v1114_v23  ;;  %v431_v35 = vmul.f32 %v497_v53, %v1106_v20 }
  0x63   : > { %v438_v47 = vadd.f32 %v430_v8, %v413_v2  ;;  %v532_v19 = vadd.f32 %v524_v3, %v1090_v14  ;;  %v457_v50 = vmul.f32 %v1108_v21, %v448_v54  ;;  %v506_v5 = vmul.f32 %v1154_v39, %v497_v53 }
  0x64   : > { %v389_v38 = vadd.f32 %v381_v49, %v364_v58  ;;  %v525_v31 = vadd.f32 %v1214_v30, %v513_v16  ;;  %v482_v20 = vmul.f32 %v1086_v13, %v473_v52 }
  0x65   : > { %v464_v51 = vadd.f32 %v456_v17, %v438_v47  ;;  %540 = vst [vmem:[%s1236_s22 + $0x20] sm:$0xff] %v532_v19 }
  0x66   : > { %v414_v9 = vadd.f32 %v406_v55, %v389_v38  ;;  %v533_v61 = vadd.f32 %v525_v31, %v1094_v15  ;;  %v507_v15 = vmul.f32 %v1154_v39, %v498_v44 }
  0x67   : > { %v489_v40 = vadd.f32 %v481_v10, %v464_v51 }
  0x68   : > { %v439_v14 = vadd.f32 %v431_v35, %v414_v9  ;;  %541 = vst [vmem:[%s1236_s22 + $0x28] sm:$0xff] %v533_v61 }
  0x69   : > { %v514_v59 = vadd.f32 %v506_v5, %v489_v40 }
  0x6a   : > { %v465_v4 = vadd.f32 %v457_v50, %v439_v14 }
  0x6b   : > { %v526_v21 = vadd.f32 %v1214_v30, %v514_v59 }
  0x6c   : > { %v490_v6 = vadd.f32 %v482_v20, %v465_v4 }
  0x6d   : > { %v534_v34 = vadd.f32 %v526_v21, %v1102_v18 }
  0x6e   : > { %v515_v63 = vadd.f32 %v507_v15, %v490_v6 }
  0x6f   : > { %542 = vst [vmem:[%s1236_s22 + $0x30] sm:$0xff] %v534_v34 }
  0x70   : > { %v527_v41 = vadd.f32 %v1214_v30, %v515_v63 }
  0x72   : > { %v535_v13 = vadd.f32 %v527_v41, %v1114_v23 }
  0x74   : > { %543 = vst [vmem:[%s1236_s22 + $0x38] sm:$0xff] %v535_v13 }
  0x75   : > { %857 = shalt.err (!%p854_p0)
}
  0x76   : > { %s922_s6 = smov 128   ;;  %s923_s7 = smov 8  }
  0x77   : > { %696 = dma.vmem_to_hbm [thread:$0]  (%p1026_p5), %s559_s19, 1024, %s561_s15, %s545_s24, %s922_s6, %s922_s6, %s923_s7  }
  0x78 PF: > { %s575_s1 = sand.u32 1, %s896_s12   ;;  %p707_p3 = pnand %p675_p11, %p993_p6 }
  0x79   : > { %s576_s20 = scalar_lea.sflag [#allocation5], %s575_s1 }
  0x7a   : > { %p708_p7 = pneg %p707_p3 }
  0x7c   : > { %891 = dma.done.wait (%p708_p7), %s576_s20, 1024  }
  0x7d   : > { %893 = vsyncadd (%p708_p7), %s576_s20, 4294966272  ;;  %s20_s17 = sadd.s32 1, %s916_s17   ;;  %s1341_s12 = smov %s900_s13 }
  0x7e   : > { %p17_p9 = scmp.ge.s32.totalorder %s20_s17, 4   ;;  %s1342_s13 = smov %s904_s14 }
  0x7f   : > { %s1343_s14 = smov %s1035_s18  ;;  %s1344_s15 = smov %s912_s16 }
  0x80   : > { %s1345_s16 = smov %s1347_s5  ;;  %19 = sbr.rel (!%p17_p9) target bundleno = 9 (0x9), region = 88 }
  0x85   :  { %582 = vsyncpa [#allocation4], 1 }
  0x86   :  { %584 = vsyncpa [#allocation4 + $0x1], 1 }
  0x87   :  { %585 = vsyncpa [#allocation7], 1 }
  0x88   :  { %586 = vsyncpa [#allocation5], 1 }
  0x89   :  { %588 = vsyncpa [#allocation5 + $0x1], 1 }

</bundles_post_ra>
